<compile_context>
chip_gen: v7x
topology: tpu7x:2x2x1
jax: 0.10.0
libtpu: 0.0.40
codegen_flags: <defaults>
</compile_context>

<pallas_src>
import jax
import jax.numpy as jnp
import numpy as np
from jax import lax
from jax.experimental import pallas as pl
from jax.experimental.pallas import tpu as pltpu

_LANES = 128


def _sublane_multiple(dtype):
    size = jnp.dtype(dtype).itemsize
    if size >= 4:
        return 8
    if size == 2:
        return 16
    return 32


def _fold_rows(x, acc_rows):
    """Reduce (rows, lanes) -> (acc_rows, lanes) with tile-aligned VALU adds.

    Pairwise (tree) halving while the group count is even, then a short linear
    fold for an odd remainder.  All slice starts are multiples of acc_rows so
    no slice crosses an (8,128) tile boundary when acc_rows >= 8.
    """
    r = x.shape[0]
    while r > acc_rows and (r // acc_rows) % 2 == 0:
        half = r // 2
        x = x[:half, :] + x[half:, :]
        r = half
    groups = r // acc_rows
    if groups > 1:
        y = x[0:acc_rows, :]
        for g in range(1, groups):
            y = y + x[g * acc_rows:(g + 1) * acc_rows, :]
        x = y
    return x


def _make_epe_kernel(*, tm, lanes, rows_total, acc_rows, masked, needs_tail):
    """EPE accumulation kernel for static tile parameters.

    Block shapes seen by the kernel:
      pred/targ : (C, tm, lanes)     native dtype; cast to f32 in-kernel
      mask      : (tm, lanes)        masked variant only (any dtype)
      epe_acc   : (acc_rows, lanes)  f32, resident across the spatial grid axis
      m_acc     : (acc_rows, lanes)  f32, masked variant only
    """

    def kernel(*refs):
        if masked:
            pred_ref, targ_ref, mask_ref, epe_acc_ref, m_acc_ref = refs
        else:
            pred_ref, targ_ref, epe_acc_ref = refs
            mask_ref = m_acc_ref = None

        c = pl.program_id(0)             # spatial-split index (megacore)
        j = pl.program_id(2)             # spatial tile index (reduction axis)
        g = c * pl.num_programs(2) + j   # global spatial block index

        @pl.when(j == 0)
        def _init():
            epe_acc_ref[...] = jnp.zeros_like(epe_acc_ref)
            if masked:
                m_acc_ref[...] = jnp.zeros_like(m_acc_ref)

        p = pred_ref[...].astype(jnp.float32)            # (C, tm, lanes)
        t = targ_ref[...].astype(jnp.float32)
        d = p - t
        # Channel reduce over the leading axis: vreg-wise VALU adds only.
        epe = jnp.sqrt(jnp.sum(d * d, axis=0))           # (tm, lanes)

        if masked:
            mval = mask_ref[...].astype(jnp.float32)
            val = epe * mval
        else:
            mval = None
            val = epe

        def accumulate(v, m):
            epe_acc_ref[...] += _fold_rows(v, acc_rows)
            if masked:
                m_acc_ref[...] += _fold_rows(m, acc_rows)

        if needs_tail:
            # Only the last (or duplicated, when a spatial split overruns the
            # block count) blocks contain rows past rows_total; all interior
            # blocks take the cheap path with no iota/compare/select work.
            is_tail = (g + 1) * tm > rows_total

            @pl.when(is_tail)
            def _tail():
                rows = lax.broadcasted_iota(jnp.int32, (tm, lanes), 0)
                ok = (g * tm + rows) < rows_total
                v2 = jnp.where(ok, val, 0.0)     # also stops OOB NaN garbage
                m2 = jnp.where(ok, mval, 0.0) if masked else None
                accumulate(v2, m2)

            @pl.when(jnp.logical_not(is_tail))
            def _interior():
                accumulate(val, mval)
        else:
            accumulate(val, mval)

    return kernel


def _vmem_capacity_bytes():
    # Generation-aware VMEM capacity (v5e/v6e: 128 MiB, v7x: 64 MiB per TC).
    try:
        cap = getattr(pltpu.get_tpu_info(), "vmem_capacity_bytes", None)
        if cap:
            return int(cap)
    except Exception:
        pass
    return 64 << 20  # conservative fallback (v7x per-TensorCore VMEM)


def disp_l2_error(output, target, mask=None, *, max_rows=4096):
    """JAX/Pallas equivalent of DispL2Error.forward. Returns an f32 scalar.

    output / target : dicts with key 'disp' of shape (B, C, H, W), NCHW.
    mask            : optional (B, H, W) array (bool or float).
    """
    disp_pred = output["disp"]
    disp = target["disp"]
    B, C, H, W = disp_pred.shape
    S = H * W
    masked = mask is not None

    # --- Spatial view: rows x lanes, with no padded HBM copies ---------------
    if S % _LANES == 0:
        # Free reshape: the whole spatial extent fills full 128-wide lanes.
        lanes, rows_total = _LANES, S // _LANES
        pred = disp_pred.reshape(B, C, rows_total, lanes)
        targ = disp.reshape(B, C, rows_total, lanes)
        m = mask.reshape(B, rows_total, lanes) if masked else None
    else:
        # Ragged spatial size: stream the raw NCHW layout (blocks of full-W
        # rows) instead of materializing jnp.pad copies of every input in HBM.
        lanes, rows_total = W, H
        pred, targ = disp_pred, disp
        m = mask if masked else None

    if masked and m.dtype == jnp.bool_:
        m = m.astype(jnp.uint8)        # 1 byte/pixel stream; f32 cast in-kernel

    # --- Tile sizing (generation-aware) ---------------------------------------
    lanes_pad = -(-lanes // _LANES) * _LANES
    bytes_per_row = lanes_pad * C * (pred.dtype.itemsize + targ.dtype.itemsize)
    if masked:
        bytes_per_row += lanes_pad * m.dtype.itemsize

    vmem_cap = _vmem_capacity_bytes()
    budget = min(vmem_cap // 2, 48 << 20)          # double-buffered input bytes
    tm_cap = max(8, budget // (2 * bytes_per_row))
    tm = min(rows_total, max_rows, tm_cap)

    # Sub-32-bit dtypes need bigger sublane multiples (bf16: 16, int8/uint8: 32).
    sub = max(_sublane_multiple(pred.dtype), _sublane_multiple(targ.dtype),
              _sublane_multiple(m.dtype) if masked else 8)
    if tm < rows_total:
        tm = max(sub, (tm // sub) * sub)
        if tm >= rows_total:
            tm = rows_total
    num_blocks = -(-rows_total // tm)

    # Megacore fallback: split the spatial range when the batch axis alone
    # can't keep both v7x TensorCores busy (B == 1 or odd B). Harmless on
    # single-TC chips (tiny extra accumulator, at most one masked extra step).
    n_split = 2 if (B % 2 == 1 and num_blocks >= 2) else 1
    num_j = -(-num_blocks // n_split)
    need_clamp = n_split * num_j > num_blocks
    needs_tail = (n_split * num_j * tm) != rows_total

    # Accumulator rows: big enough that the fold tree is shallow, small enough
    # that each per-(split,batch) output block stays tiny.
    acc_rows = tm
    for cand in (512, 256, 128, 64, 32, 16, 8):
        if tm > cand and tm % cand == 0:
            acc_rows = cand
            break

    kernel = _make_epe_kernel(tm=tm, lanes=lanes, rows_total=rows_total,
                              acc_rows=acc_rows, masked=masked,
                              needs_tail=needs_tail)

    last_block = num_blocks - 1

    def spatial_block(c, j):
        g = c * num_j + j
        if need_clamp:
            g = jnp.minimum(g, last_block)   # duplicate blocks zeroed in-kernel
        return g

    data_spec = pl.BlockSpec((None, C, tm, lanes),
                             lambda c, b, j: (b, 0, spatial_block(c, j), 0))
    acc_spec = pl.BlockSpec((None, None, acc_rows, lanes),
                            lambda c, b, j: (c, b, 0, 0))
    acc_shape = jax.ShapeDtypeStruct((n_split, B, acc_rows, lanes), jnp.float32)

    in_specs = [data_spec, data_spec]
    args = [pred, targ]
    if masked:
        in_specs.append(pl.BlockSpec((None, tm, lanes),
                                     lambda c, b, j: (b, spatial_block(c, j), 0)))
        args.append(m)
        out_shape = (acc_shape, acc_shape)
        out_specs = (acc_spec, acc_spec)
    else:
        out_shape = acc_shape
        out_specs = acc_spec

    acc_bytes = acc_rows * lanes_pad * 4 * (2 if masked else 1)
    vmem_need = 2 * tm * bytes_per_row + 4 * acc_bytes + (4 << 20)
    vmem_limit = int(min(vmem_cap - (8 << 20), max(32 << 20, vmem_need)))

    result = pl.pallas_call(
        kernel,
        out_shape=out_shape,
        grid=(n_split, B, num_j),
        in_specs=in_specs,
        out_specs=out_specs,
        compiler_params=pltpu.CompilerParams(
            # Split + batch axes parallel (v7x megacore); the innermost spatial
            # axis is the reduction whose output block is the running accumulator.
            dimension_semantics=("parallel", "parallel", "arbitrary"),
            vmem_limit_bytes=vmem_limit),
    )(*args)
    # TODO(synk): sweep pipeline_mode=pl.Buffered(3) on the data specs on v7x.

    if masked:
        epe_acc, m_acc = result
        # NaN/Inf if sum(mask) == 0 — matches the PyTorch reference behavior.
        return jnp.sum(epe_acc) / jnp.sum(m_acc)
    return jnp.sum(result) / (B * S)


def _reference(output, target, mask=None):
    d = output["disp"].astype(jnp.float32) - target["disp"].astype(jnp.float32)
    epe = jnp.sqrt(jnp.sum(d * d, axis=1))   # (B, H, W)
    if mask is None:
        return jnp.mean(epe)
    m = mask.astype(jnp.float32)
    return jnp.sum(epe * m) / jnp.sum(m)


def _check(name, got, ref, rtol=1e-4, atol=1e-5):
    got = np.asarray(jax.block_until_ready(got))
    ref = np.asarray(jax.block_until_ready(ref))
    assert np.allclose(got, ref, rtol=rtol, atol=atol), (name, got, ref)


if __name__ == "__main__":
    key = jax.random.PRNGKey(0)
    ks = jax.random.split(key, 12)
    fn = jax.jit(disp_l2_error, static_argnames=("max_rows",))

    # case 1: lane-aligned spatial size, C=2, bool mask (streamed as uint8).
    B, C, H, W = 2, 2, 16, 16
    out1 = {"disp": jax.random.normal(ks[0], (B, C, H, W), dtype=jnp.float32)}
    tgt1 = {"disp": jax.random.normal(ks[1], (B, C, H, W), dtype=jnp.float32)}
    mask1 = jax.random.uniform(ks[2], (B, H, W)) > 0.3          # bool mask
    _check("case1-masked", fn(out1, tgt1, mask1), _reference(out1, tgt1, mask1))
    _check("case1-unmasked", fn(out1, tgt1, None), _reference(out1, tgt1, None))

    # case 2: ragged spatial size (H*W=4900, not lane aligned), C=1, float mask,
    #         small max_rows -> multi-block grid with a partial tail block.
    B2, C2, H2, W2 = 2, 1, 70, 70
    out2 = {"disp": jax.random.normal(ks[3], (B2, C2, H2, W2), dtype=jnp.float32)}
    tgt2 = {"disp": jax.random.normal(ks[4], (B2, C2, H2, W2), dtype=jnp.float32)}
    mask2 = (jax.random.uniform(ks[5], (B2, H2, W2)) > 0.5).astype(jnp.float32)
    _check("case2-masked", fn(out2, tgt2, mask2, max_rows=16),
           _reference(out2, tgt2, mask2))
    _check("case2-unmasked", fn(out2, tgt2, None, max_rows=16),
           _reference(out2, tgt2, None))

    # case 3: B=1 -> spatial-split megacore path with an odd block count
    #         (exercises the clamped duplicate block + gated tail masking).
    B3, C3, H3, W3 = 1, 2, 40, 64
    out3 = {"disp": jax.random.normal(ks[6], (B3, C3, H3, W3), dtype=jnp.float32)}
    tgt3 = {"disp": jax.random.normal(ks[7], (B3, C3, H3, W3), dtype=jnp.float32)}
    mask3 = (jax.random.uniform(ks[8], (B3, H3, W3)) > 0.4).astype(jnp.float32)
    _check("case3-masked", fn(out3, tgt3, mask3, max_rows=8),
           _reference(out3, tgt3, mask3))
    _check("case3-unmasked", fn(out3, tgt3, None, max_rows=8),
           _reference(out3, tgt3, None))

    # case 4: bf16 disparities + bool mask -> sublane rounding (16/32) and the
    #         pairwise fold on a multi-block, lane-aligned grid.
    B4, C4, H4, W4 = 2, 1, 64, 128
    out4 = {"disp": jax.random.normal(ks[9], (B4, C4, H4, W4), dtype=jnp.bfloat16)}
    tgt4 = {"disp": jax.random.normal(ks[10], (B4, C4, H4, W4), dtype=jnp.bfloat16)}
    mask4 = jax.random.uniform(ks[11], (B4, H4, W4)) > 0.5       # bool mask
    _check("case4-masked", fn(out4, tgt4, mask4, max_rows=40),
           _reference(out4, tgt4, mask4))
    _check("case4-unmasked", fn(out4, tgt4, None, max_rows=40),
           _reference(out4, tgt4, None))

    print("KERNEL_OK")
</pallas_src>

<mosaic_0001>
module attributes {stable_mosaic.version = 11 : i64} {
  func.func @kernel(%arg0: i32, %arg1: i32, %arg2: i32, %arg3: memref<1x2x2x128xf32, #tpu.memory_space<vmem>>, %arg4: memref<1x2x2x128xf32, #tpu.memory_space<vmem>>, %arg5: memref<1x2x128xi8, #tpu.memory_space<vmem>>, %arg6: memref<1x1x2x128xf32, #tpu.memory_space<vmem>>, %arg7: memref<1x1x2x128xf32, #tpu.memory_space<vmem>>) attributes {dimension_semantics = [#tpu.dimension_semantics<parallel>, #tpu.dimension_semantics<parallel>, #tpu.dimension_semantics<arbitrary>], iteration_bounds = array<i64: 1, 2, 1>, scalar_prefetch = 0 : i64, scratch_operands = 0 : i64, tpu.core_type = #tpu.core_type<tc>, window_params = [{transform_indices = @transform_0, window_bounds = array<i64: 1, 2, 2, 128>}, {transform_indices = @transform_1, window_bounds = array<i64: 1, 2, 2, 128>}, {transform_indices = @transform_2, window_bounds = array<i64: 1, 2, 128>}, {transform_indices = @transform_3, window_bounds = array<i64: 1, 1, 2, 128>}, {transform_indices = @transform_4, window_bounds = array<i64: 1, 1, 2, 128>}]} {
    %c0_i32 = arith.constant 0 : i32
    %0 = arith.cmpi eq, %arg2, %c0_i32 : i32
    %1 = arith.extui %0 : i1 to i32
    %c0_i32_0 = arith.constant 0 : i32
    %2 = arith.cmpi ne, %1, %c0_i32_0 : i32
    scf.if %2 {
      %cst_27 = arith.constant 0.000000e+00 : f32
      %27 = vector.broadcast %cst_27 : f32 to vector<2x128xf32>
      %c0_28 = arith.constant 0 : index
      %c0_29 = arith.constant 0 : index
      %c0_30 = arith.constant 0 : index
      %c0_31 = arith.constant 0 : index
      %28 = vector.load %arg6[%c0_28, %c0_29, %c0_30, %c0_31] : memref<1x1x2x128xf32, #tpu.memory_space<vmem>>, vector<1x1x2x128xf32>
      %29 = vector.shape_cast %28 : vector<1x1x2x128xf32> to vector<2x128xf32>
      %30 = vector.shape_cast %27 : vector<2x128xf32> to vector<1x1x2x128xf32>
      tpu.vector_store %arg6[%c0_28, %c0_29, %c0_30, %c0_31], %30 {strides = array<i32>} : memref<1x1x2x128xf32, #tpu.memory_space<vmem>>, vector<1x1x2x128xf32>,
      %cst_32 = arith.constant 0.000000e+00 : f32
      %31 = vector.broadcast %cst_32 : f32 to vector<2x128xf32>
      %c0_33 = arith.constant 0 : index
      %c0_34 = arith.constant 0 : index
      %c0_35 = arith.constant 0 : index
      %c0_36 = arith.constant 0 : index
      %32 = vector.load %arg7[%c0_33, %c0_34, %c0_35, %c0_36] : memref<1x1x2x128xf32, #tpu.memory_space<vmem>>, vector<1x1x2x128xf32>
      %33 = vector.shape_cast %32 : vector<1x1x2x128xf32> to vector<2x128xf32>
      %34 = vector.shape_cast %31 : vector<2x128xf32> to vector<1x1x2x128xf32>
      tpu.vector_store %arg7[%c0_33, %c0_34, %c0_35, %c0_36], %34 {strides = array<i32>} : memref<1x1x2x128xf32, #tpu.memory_space<vmem>>, vector<1x1x2x128xf32>,
    } else {
    }
    %c0 = arith.constant 0 : index
    %c0_1 = arith.constant 0 : index
    %c0_2 = arith.constant 0 : index
    %c0_3 = arith.constant 0 : index
    %3 = vector.load %arg3[%c0, %c0_1, %c0_2, %c0_3] : memref<1x2x2x128xf32, #tpu.memory_space<vmem>>, vector<1x2x2x128xf32>
    %4 = vector.shape_cast %3 : vector<1x2x2x128xf32> to vector<2x2x128xf32>
    %c0_4 = arith.constant 0 : index
    %c0_5 = arith.constant 0 : index
    %c0_6 = arith.constant 0 : index
    %c0_7 = arith.constant 0 : index
    %5 = vector.load %arg4[%c0_4, %c0_5, %c0_6, %c0_7] : memref<1x2x2x128xf32, #tpu.memory_space<vmem>>, vector<1x2x2x128xf32>
    %6 = vector.shape_cast %5 : vector<1x2x2x128xf32> to vector<2x2x128xf32>
    %7 = arith.subf %4, %6 : vector<2x2x128xf32>
    %8 = arith.mulf %7, %7 : vector<2x2x128xf32>
    %cst = arith.constant dense<0.000000e+00> : vector<2x128xf32>
    %9 = vector.multi_reduction <add>, %8, %cst [0] : vector<2x2x128xf32> to vector<2x128xf32>
    %10 = math.sqrt %9 : vector<2x128xf32>
    %c0_8 = arith.constant 0 : index
    %c0_9 = arith.constant 0 : index
    %c0_10 = arith.constant 0 : index
    %11 = vector.load %arg5[%c0_8, %c0_9, %c0_10] : memref<1x2x128xi8, #tpu.memory_space<vmem>>, vector<1x2x128xi8>
    %12 = vector.shape_cast %11 : vector<1x2x128xi8> to vector<2x128xi8>
    %13 = arith.uitofp %12 : vector<2x128xi8> to vector<2x128xf32>
    %14 = arith.mulf %10, %13 : vector<2x128xf32>
    %c0_11 = arith.constant 0 : index
    %c0_12 = arith.constant 0 : index
    %c0_13 = arith.constant 0 : index
    %c0_14 = arith.constant 0 : index
    %15 = vector.load %arg6[%c0_11, %c0_12, %c0_13, %c0_14] : memref<1x1x2x128xf32, #tpu.memory_space<vmem>>, vector<1x1x2x128xf32>
    %16 = vector.shape_cast %15 : vector<1x1x2x128xf32> to vector<2x128xf32>
    %17 = arith.addf %16, %14 : vector<2x128xf32>
    %c0_15 = arith.constant 0 : index
    %c0_16 = arith.constant 0 : index
    %c0_17 = arith.constant 0 : index
    %c0_18 = arith.constant 0 : index
    %18 = vector.load %arg6[%c0_15, %c0_16, %c0_17, %c0_18] : memref<1x1x2x128xf32, #tpu.memory_space<vmem>>, vector<1x1x2x128xf32>
    %19 = vector.shape_cast %18 : vector<1x1x2x128xf32> to vector<2x128xf32>
    %20 = vector.shape_cast %17 : vector<2x128xf32> to vector<1x1x2x128xf32>
    tpu.vector_store %arg6[%c0_15, %c0_16, %c0_17, %c0_18], %20 {strides = array<i32>} : memref<1x1x2x128xf32, #tpu.memory_space<vmem>>, vector<1x1x2x128xf32>,
    %c0_19 = arith.constant 0 : index
    %c0_20 = arith.constant 0 : index
    %c0_21 = arith.constant 0 : index
    %c0_22 = arith.constant 0 : index
    %21 = vector.load %arg7[%c0_19, %c0_20, %c0_21, %c0_22] : memref<1x1x2x128xf32, #tpu.memory_space<vmem>>, vector<1x1x2x128xf32>
    %22 = vector.shape_cast %21 : vector<1x1x2x128xf32> to vector<2x128xf32>
    %23 = arith.addf %22, %13 : vector<2x128xf32>
    %c0_23 = arith.constant 0 : index
    %c0_24 = arith.constant 0 : index
    %c0_25 = arith.constant 0 : index
    %c0_26 = arith.constant 0 : index
    %24 = vector.load %arg7[%c0_23, %c0_24, %c0_25, %c0_26] : memref<1x1x2x128xf32, #tpu.memory_space<vmem>>, vector<1x1x2x128xf32>
    %25 = vector.shape_cast %24 : vector<1x1x2x128xf32> to vector<2x128xf32>
    %26 = vector.shape_cast %23 : vector<2x128xf32> to vector<1x1x2x128xf32>
    tpu.vector_store %arg7[%c0_23, %c0_24, %c0_25, %c0_26], %26 {strides = array<i32>} : memref<1x1x2x128xf32, #tpu.memory_space<vmem>>, vector<1x1x2x128xf32>,
    return
  }
  func.func @transform_0(%arg0: i32, %arg1: i32, %arg2: i32) -> (i32, i32, i32, i32) {
    %c1_i32 = arith.constant 1 : i32
    %0 = arith.muli %arg0, %c1_i32 : i32
    %1 = arith.addi %0, %arg2 : i32
    %c0_i32 = arith.constant 0 : i32
    %c0_i32_0 = arith.constant 0 : i32
    %c0_i32_1 = arith.constant 0 : i32
    return %arg1, %c0_i32, %1, %c0_i32_0 : i32, i32, i32, i32
  }
  func.func @transform_1(%arg0: i32, %arg1: i32, %arg2: i32) -> (i32, i32, i32, i32) {
    %c1_i32 = arith.constant 1 : i32
    %0 = arith.muli %arg0, %c1_i32 : i32
    %1 = arith.addi %0, %arg2 : i32
    %c0_i32 = arith.constant 0 : i32
    %c0_i32_0 = arith.constant 0 : i32
    %c0_i32_1 = arith.constant 0 : i32
    return %arg1, %c0_i32, %1, %c0_i32_0 : i32, i32, i32, i32
  }
  func.func @transform_2(%arg0: i32, %arg1: i32, %arg2: i32) -> (i32, i32, i32) {
    %c1_i32 = arith.constant 1 : i32
    %0 = arith.muli %arg0, %c1_i32 : i32
    %1 = arith.addi %0, %arg2 : i32
    %c0_i32 = arith.constant 0 : i32
    %c0_i32_0 = arith.constant 0 : i32
    return %arg1, %1, %c0_i32 : i32, i32, i32
  }
  func.func @transform_3(%arg0: i32, %arg1: i32, %arg2: i32) -> (i32, i32, i32, i32) {
    %c0_i32 = arith.constant 0 : i32
    %c0_i32_0 = arith.constant 0 : i32
    %c0_i32_1 = arith.constant 0 : i32
    return %arg0, %arg1, %c0_i32, %c0_i32_0 : i32, i32, i32, i32
  }
  func.func @transform_4(%arg0: i32, %arg1: i32, %arg2: i32) -> (i32, i32, i32, i32) {
    %c0_i32 = arith.constant 0 : i32
    %c0_i32_0 = arith.constant 0 : i32
    %c0_i32_1 = arith.constant 0 : i32
    return %arg0, %arg1, %c0_i32, %c0_i32_0 : i32, i32, i32, i32
  }
}

</mosaic_0001>

<bundles_post_ra>
// kernel: disp_l2_error.1
= control target key start
LH: loop header
LB: loop body
LE: loop exit
PB: predicated region body
PF: predicated region fallthrough
CT: control target
= control target key end

     0   :  { %s625_s15 = smov 0   ;;  %s627_s16 = smov 0   ;;  %s672_s0 = inlined_call_operand.vmem [shape: f32[2,2,2,128], index: 0, kind: input, shape index: {}]   ;;  %s673_s1 = inlined_call_operand.vmem [shape: f32[2,2,2,128], index: 1, kind: input, shape index: {}]   ;;  %s674_s2 = inlined_call_operand.vmem [shape: u8[2,2,128], index: 2, kind: input, shape index: {}]   ;;  %s675_s3 = inlined_call_operand.vmem [shape: f32[1,2,2,128], index: 3, kind: output, shape index: {0}]   ;;  %s676_s4 = inlined_call_operand.vmem [shape: f32[1,2,2,128], index: 4, kind: output, shape index: {1}]  }
   0x1   :  { %s629_s17 = smov 0  }
   0x2 LB: > { %s30_s18 = sadd.s32 1, %s593_s16  ;;  %p537_p0 = scmp.ge.s32.totalorder %s597_s17, 1  ;;  %s597_s17 = sphi %s629_s17, %s15_s17   ;;  %s593_s16 = sphi %s627_s16, %s678_s16   ;;  %s589_s15 = sphi %s625_s15, %s677_s15  }
   0x3   : > { %p32_p1 = scmp.ge.s32.totalorder %s30_s18, 2  ;;  %p233_p2 = scmp.lt.s32.totalorder %s597_s17, 3 }
   0x5   : > { %s680_s18 = smov (%p32_p1, %s30_s18), 0  ;;  %p234_p3 = pnand %p537_p0, %p233_p2 }
   0x6   : > { %p291_p4 = scmp.lt.s32.totalorder (!%p234_p3), %s589_s15, 1  ;;  %v599_v3 = vmov (!%p234_p3), 0.0   ;;  %vm348_vm0 = vcmask (!%p234_p3), 1041408  }
   0x7   : > { %237 = sbr.rel (%p234_p3) target bundleno = 46 (0x2e), region = 32 }
   0xe   : > { %s682_s15 = smov (!%p291_p4, %s589_s15), 1 }
   0xf   : > { %s546_s19 = sshll.u32 %s682_s15, 2  ;;  %s542_s20 = sshll.u32 %s682_s15, 1 }
  0x10   : > { %s298_s23 = scalar_lea.vmem %s672_s0, %s546_s19  ;;  %s308_s26 = scalar_lea.vmem %s673_s1, %s546_s19 }
  0x11   : > { %s652_s29 = scalar_lea.vmem %s675_s3, %s542_s20  ;;  %v340_v0 = vld [vmem:[%s298_s23] sm:$0x3]  ;;  %v341_v1 = vld [vmem:[%s298_s23 + $0x2] sm:$0x3]  ;;  %s333_s6 = scalar_lea.vmem %s676_s4, %s542_s20 }
  0x12   : > { %v342_v2 = vld [vmem:[%s308_s26] sm:$0x3]  ;;  %338 = vst [vmem:[%s652_s29] sm:$0x3] %v599_v3  ;;  %v343_v4 = vld [vmem:[%s308_s26 + $0x2] sm:$0x3]  ;;  %339 = vst [vmem:[%s333_s6] sm:$0x3] %v599_v3  ;;  %s316_s9 = scalar_lea.vmem %s674_s2, %s682_s15 }
  0x13   : > { %v344_v5 = vsub.f32 %v340_v0, %v342_v2  ;;  %v345_v6 = vsub.f32 %v341_v1, %v343_v4  ;;  %v359_v7 = vld [vmem:[%s316_s9] sm:$0x1] }
  0x14   : > { %v360_v9 = vunpack.c.0.s8 %v359_v7 }
  0x15   : > { %v346_v8 = vmul.f32 %v344_v5, %v344_v5  ;;  %v347_v10 = vmul.f32 %v345_v6, %v345_v6 }
  0x16   : > { %v361_v12 = vand.u32 255, %v360_v9 }
  0x17   : > { %v349_v11 = vsel %vm348_vm0, %v346_v8, 0.0  ;;  %v350_v13 = vsel %vm348_vm0, %v347_v10, 0.0 }
  0x18   : > { %v351_v14 = vadd.f32 %v350_v13, %v349_v11  ;;  %v362_v15 = vcvt.s32.f32 %v361_v12 }
  0x19   : > { %v367_v16 = vld [vmem:[%s333_s6] sm:$0x3] }
  0x1a   : > { %573 = vrsqrt.f32 %v351_v14  ;;  %v368_v17 = vadd.f32 %v367_v16, %v362_v15  ;;  %vm354_vm1 = vcmp.eq.f32.partialorder %v351_v14, inf  ;;  %v357_v19 = vand.u32 2147483648, %v351_v14  ;;  %v364_v23 = vld [vmem:[%s652_s29] sm:$0x3] }
  0x1b   : > { %vm356_vm2 = vcmp.eq.f32.partialorder %v351_v14, 0.0 }
  0x1c   : > { %369 = vst [vmem:[%s333_s6] sm:$0x3] %v368_v17 }
  0x24   : > { %v574_v18 = vpop.eup %573 }
  0x25   : > { %v353_v20 = vmul.f32 %v574_v18, %v351_v14 }
  0x27   : > { %v355_v21 = vsel %vm354_vm1, %v351_v14, %v353_v20 }
  0x28   : > { %v358_v22 = vsel %vm356_vm2, %v357_v19, %v355_v21 }
  0x29   : > { %v363_v24 = vmul.f32 %v362_v15, %v358_v22 }
  0x2b   : > { %v365_v25 = vadd.f32 %v364_v23, %v363_v24 }
  0x2d   : > { %366 = vst [vmem:[%s652_s29] sm:$0x3] %v365_v25 }
  0x2e PF: > { %s15_s17 = sadd.s32 1, %s597_s17   ;;  %s677_s15 = smov %s593_s16 }
  0x2f   : > { %p12_p5 = scmp.ge.s32.totalorder %s15_s17, 4   ;;  %s678_s16 = smov %s680_s18 }
  0x31   :  { %14 = sbr.rel (!%p12_p5) target bundleno = 2 (0x2), region = 84 }

</bundles_post_ra>
